<compile_context>
chip_gen: v7x
topology: tpu7x:2x2x1
jax: 0.10.0
libtpu: 0.0.40
codegen_flags: <defaults>
</compile_context>

<pallas_src>
import jax
import jax.numpy as jnp
from jax.experimental import pallas as pl
from jax.experimental.pallas import tpu as pltpu

_LANE = 128
_MIB = 1024 * 1024


def _round_up(x, m):
    return ((x + m - 1) // m) * m


def _sublane_quantum(itemsize):
    # f32 -> 8 sublanes, bf16 -> 16, int8 -> 32 (packed tiling).
    return max(8, 32 // max(1, itemsize))


def _tiled_bytes_2d(rows, cols, itemsize):
    """VMEM footprint of a (rows, cols) tile after (sublane, 128) tiling."""
    sub = _sublane_quantum(itemsize)
    return _round_up(max(rows, 1), sub) * _round_up(max(cols, 1), _LANE) * itemsize


def _vmem_capacity_bytes():
    try:
        cap = getattr(pltpu.get_tpu_info(), "vmem_capacity_bytes", None)
        if cap:
            return int(cap)
    except Exception:
        pass
    return 64 * _MIB  # v7x physical VMEM: safe lower bound across generations.


def _pick_block_rows(total, per_row_bytes, budget, quantum):
    """Rows (channels) per grid block: largest quantum-aligned count whose
    double-buffered in+out blocks fit `budget`; split 2-way only when the whole
    tensor would be one step and each half is still a >=4 MiB DMA burst."""
    max_rows = max(1, budget // max(1, 2 * per_row_bytes))  # 2x: double-buffered
    if max_rows >= total:
        rows = total
    else:
        rows = max(quantum, (max_rows // quantum) * quantum)
    rows = min(rows, total)
    if rows >= total and total > quantum:
        half = _round_up((total + 1) // 2, quantum)
        if half < total and half * per_row_bytes >= 4 * _MIB:
            rows = half
    return rows


def _segments_flat(h1, w1, w2, pad_top, pad_bottom, pad_left, pad_right):
    """Padded flat row = concat of these segments: ('z', n) zeros or ('x', a, b)
    columns [a, b) of the flat input row. Adjacent zeros / contiguous data are
    merged (diffX == 0 collapses to [zeros, x, zeros])."""
    segs = []

    def zero(n):
        if n <= 0:
            return
        if segs and segs[-1][0] == "z":
            segs[-1] = ("z", segs[-1][1] + n)
        else:
            segs.append(("z", n))

    def data(a, b):
        if segs and segs[-1][0] == "x" and segs[-1][2] == a:
            segs[-1] = ("x", segs[-1][1], b)
        else:
            segs.append(("x", a, b))

    zero(pad_top * w2)
    for h in range(h1):
        zero(pad_left)
        data(h * w1, (h + 1) * w1)
        zero(pad_right)
    zero(pad_bottom * w2)
    return segs


def _make_flat_kernel(segs, c_blk, rr):
    """Lane-dense path: x_ref (c_blk, H1*W1) -> o_ref (c_blk, H2*W2)."""
    n_full = c_blk // rr
    tail = c_blk - n_full * rr

    def kernel(x_ref, o_ref):
        dt = o_ref.dtype

        def emit(start, rows):
            x = x_ref[pl.ds(start, rows), :]
            parts = []
            for s in segs:
                if s[0] == "z":
                    parts.append(jnp.zeros((rows, s[1]), dt))
                else:
                    parts.append(x[:, s[1]:s[2]])
            out = parts[0] if len(parts) == 1 else jnp.concatenate(parts, axis=1)
            # Single lane-offset-0, lane-dense store per chunk.
            o_ref[pl.ds(start, rows), :] = out

        if n_full > 0:
            @pl.loop(0, n_full)
            def _(i):
                emit(pl.multiple_of(i * rr, 8), rr)
        if tail > 0:
            emit(n_full * rr, tail)

    return kernel


def _make_nchw_kernel(h1, w1, h2, w2, pad_top, pad_bottom, pad_left, pad_right,
                      c_blk, cc, hh):
    """Wide-spatial path: x_ref (c_blk, H1, W1) -> o_ref (c_blk, H2, W2)."""
    n_full = c_blk // cc
    tail = c_blk - n_full * cc

    def kernel(x_ref, o_ref):
        dt = o_ref.dtype

        def emit(c0, cn):
            if pad_top:
                o_ref[pl.ds(c0, cn), pl.ds(0, pad_top), :] = jnp.zeros(
                    (cn, pad_top, w2), dt)
            if pad_bottom:
                o_ref[pl.ds(c0, cn), pl.ds(pad_top + h1, pad_bottom), :] = jnp.zeros(
                    (cn, pad_bottom, w2), dt)
            for h0 in range(0, h1, hh):
                hc = min(hh, h1 - h0)
                x = x_ref[pl.ds(c0, cn), pl.ds(h0, hc), :]
                parts = []
                if pad_left:
                    parts.append(jnp.zeros((cn, hc, pad_left), dt))
                parts.append(x)
                if pad_right:
                    parts.append(jnp.zeros((cn, hc, pad_right), dt))
                xw = parts[0] if len(parts) == 1 else jnp.concatenate(parts, axis=2)
                o_ref[pl.ds(c0, cn), pl.ds(pad_top + h0, hc), :] = xw

        if n_full > 0:
            @pl.loop(0, n_full)
            def _(i):
                emit(i * cc, cc)
        if tail > 0:
            emit(n_full * cc, tail)

    return kernel


def resize(x1, x2):
    """Pallas equivalent of Resize.forward(x1, x2): zero-pad x1 to x2's H/W."""
    n, c, h1, w1 = x1.shape
    h2, w2 = x2.shape[2], x2.shape[3]
    diff_y, diff_x = h2 - h1, w2 - w1
    # TODO(synk): negative diffs (cropping, as F.pad with negative pads would do)
    # are not handled; typical U-Net usage has x2 >= x1 spatially.
    assert diff_y >= 0 and diff_x >= 0, (
        "resize kernel only supports zero-padding (x2 >= x1)")

    if diff_y == 0 and diff_x == 0:
        return x1  # nothing to pad: skip the HBM round-trip entirely

    pad_left, pad_right = diff_x // 2, diff_x - diff_x // 2
    pad_top, pad_bottom = diff_y // 2, diff_y - diff_y // 2

    isz = jnp.dtype(x1.dtype).itemsize
    nc = n * c
    cap = _vmem_capacity_bytes()
    budget = min(48 * _MIB, int(cap * 0.7))   # double-buffered in+out blocks
    chunk_bytes = 64 * 1024                   # per in-kernel chunk (vreg budget)

    # Deep-stage shapes (small W2): W-minor NCHW tiles waste >=2x VMEM and make
    # stores lane-masked -> present lane-dense (N*C, H*W) slabs instead.
    use_flat = (w2 % _LANE != 0) and (w2 <= 64) and (h1 <= 64) and (h2 <= 128)

    if use_flat:
        in_row = _round_up(h1 * w1, _LANE) * isz
        out_row = _round_up(h2 * w2, _LANE) * isz
        rr = max(8, (chunk_bytes // max(1, in_row + out_row)) // 8 * 8)
        c_blk = _pick_block_rows(nc, in_row + out_row, budget, rr)
        grid = (pl.cdiv(nc, c_blk),)
        ws = 2 * (_tiled_bytes_2d(c_blk, h1 * w1, isz)
                  + _tiled_bytes_2d(c_blk, h2 * w2, isz))
        kernel = _make_flat_kernel(
            _segments_flat(h1, w1, w2, pad_top, pad_bottom, pad_left, pad_right),
            c_blk, rr)
        x_in = x1.reshape(nc, h1 * w1)
        out_shape = jax.ShapeDtypeStruct((nc, h2 * w2), x1.dtype)
        in_spec = pl.BlockSpec((c_blk, h1 * w1), lambda i: (i, 0))
        out_spec = pl.BlockSpec((c_blk, h2 * w2), lambda i: (i, 0))
    else:
        in_ch = _tiled_bytes_2d(h1, w1, isz)
        out_ch = _tiled_bytes_2d(h2, w2, isz)
        c_blk = _pick_block_rows(nc, in_ch + out_ch, budget, 1)
        grid = (pl.cdiv(nc, c_blk),)
        ws = 2 * c_blk * (in_ch + out_ch)
        if in_ch + out_ch <= chunk_bytes:
            cc = max(1, min(c_blk, chunk_bytes // (in_ch + out_ch)))
            hh = h1
        else:
            row_pair = (_round_up(w1, _LANE) + _round_up(w2, _LANE)) * isz
            cc = 1
            hh = min(h1, max(8, (chunk_bytes // max(1, row_pair)) // 8 * 8))
        kernel = _make_nchw_kernel(h1, w1, h2, w2, pad_top, pad_bottom,
                                   pad_left, pad_right, c_blk, cc, hh)
        x_in = x1.reshape(nc, h1, w1)
        out_shape = jax.ShapeDtypeStruct((nc, h2, w2), x1.dtype)
        in_spec = pl.BlockSpec((c_blk, h1, w1), lambda i: (i, 0, 0))
        out_spec = pl.BlockSpec((c_blk, h2, w2), lambda i: (i, 0, 0))

    vmem_limit = min(int(cap * 0.85), max(16 * _MIB, ws + 8 * _MIB))
    bytes_accessed = nc * (h1 * w1 + h2 * w2) * isz

    # TODO(synk): the largest remaining win is fusing this zero-pad into its
    # consumer (the U-Net channel-concat / following conv), eliminating a full
    # HBM round-trip of x1; kept standalone to match the module boundary.
    out = pl.pallas_call(
        kernel,
        out_shape=out_shape,
        grid_spec=pltpu.PrefetchScalarGridSpec(
            num_scalar_prefetch=0,
            grid=grid,
            in_specs=[in_spec],
            out_specs=out_spec,
        ),
        compiler_params=pltpu.CompilerParams(
            dimension_semantics=("parallel",),
            vmem_limit_bytes=vmem_limit,
        ),
        cost_estimate=pl.CostEstimate(
            flops=0, transcendentals=0, bytes_accessed=bytes_accessed),
    )(x_in)
    return out.reshape(n, c, h2, w2)


if __name__ == "__main__":
    key = jax.random.PRNGKey(0)
    k1, k2, k3, k4 = jax.random.split(key, 4)

    def _ref_pad(a, h2, w2):
        dy, dx = h2 - a.shape[2], w2 - a.shape[3]
        return jnp.pad(a, ((0, 0), (0, 0),
                           (dy // 2, dy - dy // 2),
                           (dx // 2, dx - dx // 2)))

    # Deep U-Net stage shape (exercises the lane-dense flat-slab path).
    x1 = jax.random.normal(k1, (2, 4, 13, 14), dtype=jnp.float32)
    x2 = jax.random.normal(k2, (2, 4, 16, 16), dtype=jnp.float32)
    out = jax.block_until_ready(resize(x1, x2))
    assert out.shape == (2, 4, 16, 16)
    assert jnp.allclose(out, _ref_pad(x1, 16, 16))

    # Wide stage (W2 multiple of 128 -> NCHW path).
    x3 = jax.random.normal(k3, (1, 2, 12, 126), dtype=jnp.float32)
    x4 = jax.random.normal(k4, (1, 2, 16, 128), dtype=jnp.float32)
    out2 = jax.block_until_ready(resize(x3, x4))
    assert out2.shape == (1, 2, 16, 128)
    assert jnp.allclose(out2, _ref_pad(x3, 16, 128))

    # No-pad fast path.
    same = jax.block_until_ready(resize(x2, x2))
    assert jnp.allclose(same, x2)

    print("KERNEL_OK")
</pallas_src>

<mosaic_0001>
module attributes {stable_mosaic.version = 11 : i64} {
  func.func @kernel(%arg0: i32, %arg1: memref<8x182xf32, #tpu.memory_space<vmem>>, %arg2: memref<8x256xf32, #tpu.memory_space<vmem>>) attributes {dimension_semantics = [#tpu.dimension_semantics<parallel>], iteration_bounds = array<i64: 1>, scalar_prefetch = 0 : i64, scratch_operands = 0 : i64, tpu.core_type = #tpu.core_type<tc>, window_params = [{transform_indices = @transform_0, window_bounds = array<i64: 8, 182>}, {transform_indices = @transform_1, window_bounds = array<i64: 8, 256>}]} {
    %c0 = arith.constant 0 : index
    %c0_0 = arith.constant 0 : index
    %0 = vector.load %arg1[%c0, %c0_0] : memref<8x182xf32, #tpu.memory_space<vmem>>, vector<8x182xf32>
    %cst = arith.constant 0.000000e+00 : f32
    %1 = vector.broadcast %cst : f32 to vector<8x17xf32>
    %2 = vector.extract_strided_slice %0 {offsets = [0, 0], sizes = [8, 14], strides = [1, 1]} : vector<8x182xf32> to vector<8x14xf32>
    %cst_1 = arith.constant 0.000000e+00 : f32
    %3 = vector.broadcast %cst_1 : f32 to vector<8x2xf32>
    %4 = vector.extract_strided_slice %0 {offsets = [0, 14], sizes = [8, 14], strides = [1, 1]} : vector<8x182xf32> to vector<8x14xf32>
    %cst_2 = arith.constant 0.000000e+00 : f32
    %5 = vector.broadcast %cst_2 : f32 to vector<8x2xf32>
    %6 = vector.extract_strided_slice %0 {offsets = [0, 28], sizes = [8, 14], strides = [1, 1]} : vector<8x182xf32> to vector<8x14xf32>
    %cst_3 = arith.constant 0.000000e+00 : f32
    %7 = vector.broadcast %cst_3 : f32 to vector<8x2xf32>
    %8 = vector.extract_strided_slice %0 {offsets = [0, 42], sizes = [8, 14], strides = [1, 1]} : vector<8x182xf32> to vector<8x14xf32>
    %cst_4 = arith.constant 0.000000e+00 : f32
    %9 = vector.broadcast %cst_4 : f32 to vector<8x2xf32>
    %10 = vector.extract_strided_slice %0 {offsets = [0, 56], sizes = [8, 14], strides = [1, 1]} : vector<8x182xf32> to vector<8x14xf32>
    %cst_5 = arith.constant 0.000000e+00 : f32
    %11 = vector.broadcast %cst_5 : f32 to vector<8x2xf32>
    %12 = vector.extract_strided_slice %0 {offsets = [0, 70], sizes = [8, 14], strides = [1, 1]} : vector<8x182xf32> to vector<8x14xf32>
    %cst_6 = arith.constant 0.000000e+00 : f32
    %13 = vector.broadcast %cst_6 : f32 to vector<8x2xf32>
    %14 = vector.extract_strided_slice %0 {offsets = [0, 84], sizes = [8, 14], strides = [1, 1]} : vector<8x182xf32> to vector<8x14xf32>
    %cst_7 = arith.constant 0.000000e+00 : f32
    %15 = vector.broadcast %cst_7 : f32 to vector<8x2xf32>
    %16 = vector.extract_strided_slice %0 {offsets = [0, 98], sizes = [8, 14], strides = [1, 1]} : vector<8x182xf32> to vector<8x14xf32>
    %cst_8 = arith.constant 0.000000e+00 : f32
    %17 = vector.broadcast %cst_8 : f32 to vector<8x2xf32>
    %18 = vector.extract_strided_slice %0 {offsets = [0, 112], sizes = [8, 14], strides = [1, 1]} : vector<8x182xf32> to vector<8x14xf32>
    %cst_9 = arith.constant 0.000000e+00 : f32
    %19 = vector.broadcast %cst_9 : f32 to vector<8x2xf32>
    %20 = vector.extract_strided_slice %0 {offsets = [0, 126], sizes = [8, 14], strides = [1, 1]} : vector<8x182xf32> to vector<8x14xf32>
    %cst_10 = arith.constant 0.000000e+00 : f32
    %21 = vector.broadcast %cst_10 : f32 to vector<8x2xf32>
    %22 = vector.extract_strided_slice %0 {offsets = [0, 140], sizes = [8, 14], strides = [1, 1]} : vector<8x182xf32> to vector<8x14xf32>
    %cst_11 = arith.constant 0.000000e+00 : f32
    %23 = vector.broadcast %cst_11 : f32 to vector<8x2xf32>
    %24 = vector.extract_strided_slice %0 {offsets = [0, 154], sizes = [8, 14], strides = [1, 1]} : vector<8x182xf32> to vector<8x14xf32>
    %cst_12 = arith.constant 0.000000e+00 : f32
    %25 = vector.broadcast %cst_12 : f32 to vector<8x2xf32>
    %26 = vector.extract_strided_slice %0 {offsets = [0, 168], sizes = [8, 14], strides = [1, 1]} : vector<8x182xf32> to vector<8x14xf32>
    %cst_13 = arith.constant 0.000000e+00 : f32
    %27 = vector.broadcast %cst_13 : f32 to vector<8x33xf32>
    %28 = tpu.concatenate %1, %2, %3, %4, %5, %6, %7, %8, %9, %10, %11, %12, %13, %14, %15, %16 in 1 : vector<8x17xf32>, vector<8x14xf32>, vector<8x2xf32>, vector<8x14xf32>, vector<8x2xf32>, vector<8x14xf32>, vector<8x2xf32>, vector<8x14xf32>, vector<8x2xf32>, vector<8x14xf32>, vector<8x2xf32>, vector<8x14xf32>, vector<8x2xf32>, vector<8x14xf32>, vector<8x2xf32>, vector<8x14xf32> -> vector<8x143xf32>
    %29 = tpu.concatenate %17, %18, %19, %20, %21, %22, %23, %24, %25, %26, %27 in 1 : vector<8x2xf32>, vector<8x14xf32>, vector<8x2xf32>, vector<8x14xf32>, vector<8x2xf32>, vector<8x14xf32>, vector<8x2xf32>, vector<8x14xf32>, vector<8x2xf32>, vector<8x14xf32>, vector<8x33xf32> -> vector<8x113xf32>
    %30 = tpu.concatenate %28, %29 in 1 : vector<8x143xf32>, vector<8x113xf32> -> vector<8x256xf32>
    %c0_14 = arith.constant 0 : index
    %c0_15 = arith.constant 0 : index
    %31 = vector.load %arg2[%c0_14, %c0_15] : memref<8x256xf32, #tpu.memory_space<vmem>>, vector<8x256xf32>
    tpu.vector_store %arg2[%c0_14, %c0_15], %30 {strides = array<i32>} : memref<8x256xf32, #tpu.memory_space<vmem>>, vector<8x256xf32>,
    return
  }
  func.func @transform_0(%arg0: i32) -> (i32, i32) {
    %c0_i32 = arith.constant 0 : i32
    %c0_i32_0 = arith.constant 0 : i32
    return %arg0, %c0_i32 : i32, i32
  }
  func.func @transform_1(%arg0: i32) -> (i32, i32) {
    %c0_i32 = arith.constant 0 : i32
    %c0_i32_0 = arith.constant 0 : i32
    return %arg0, %c0_i32 : i32, i32
  }
}

</mosaic_0001>

<bundles_post_ra>
// kernel: tpu_custom_call.1
= control target key start
LH: loop header
LB: loop body
LE: loop exit
PB: predicated region body
PF: predicated region fallthrough
CT: control target
= control target key end

     0   :  { %6 = vsyncpa [#allocation3], 0  ;;  %s255_s0 = inlined_call_operand.hbm [shape: f32[8,182], index: 0, kind: input, shape index: {}]   ;;  %s256_s1 = inlined_call_operand.hbm [shape: f32[8,256], index: 1, kind: output, shape index: {}]  }
   0x1   :  { %7 = vsyncpa [#allocation4], 0  ;;  %s205_s6 = smov [#allocation2]   ;;  %s157_s10 = scalar_lea.hbm %s255_s0, 256 }
   0x2   :  { %s14_s7 = sshll.u32 %s205_s6, 4  ;;  %p158_p0 = scmp.ne.s32.totalorder %s255_s0, %s157_s10  ;;  %s15_s7 = int_to_ptr.vmem [resolvable:$true] %s14_s7 }
   0x3   :  { %p161_p1 = scmp.lt.u32.totalorder %s157_s10, %s255_s0 }
   0x5   :  { %p163_p2 = pnand %p161_p1, %p158_p0 }
   0x7   :  { %166 = shalt.err (!%p163_p2)
}
   0x8   :  { %s167_s15 = scalar_lea.vmem %s15_s7, 256  ;;  %p172_p4 = scmp.lt.s32.totalorder %s15_s7, %s15_s7 }
   0x9   :  { %p168_p3 = scmp.ne.s32.totalorder %s15_s7, %s167_s15  ;;  %p173_p5 = scmp.lt.s32.totalorder %s167_s15, %s167_s15 }
   0xb   :  { %p174_p6 = por %p173_p5, %p172_p4 }
   0xd   :  { %p175_p7 = pnand %p174_p6, %p168_p3 }
   0xf   :  { %178 = shalt.err (!%p175_p7)
}
  0x10   :  { %17 = dma.hbm_to_vmem [thread:$0]  %s255_s0, 256, %s15_s7, [#allocation3]  }
  0x11   :  { %201 = dma.done.wait [#allocation3], 256  }
  0x12   :  { %202 = vsyncadd [#allocation3], 4294967040  ;;  %v21_v0 = vld [vmem:[#allocation2] sm:$0xff]  ;;  %v22_v1 = vld [vmem:[#allocation2 + $0x8] sm:$0xff]  ;;  %s206_s18 = smov 18   ;;  %s207_s19 = smov 20  }
  0x13   :  { %78 = vrot.lane.b32.xlu0 %v21_v0, %s206_s18  ;;  %84 = vrot.lane.b32.xlu1 %v22_v1, %s207_s19  ;;  %s208_s20 = smov 22   ;;  %s209_s21 = smov 24   ;;  %vm98_vm0 = vcmask 15360   ;;  %vm100_vm1 = vcmask 130048   ;;  %vm86_vm2 = vcmask 162816   ;;  %vm102_vm3 = vcmask 146432  }
  0x14   :  { %s210_s22 = smov 26   ;;  %s211_s23 = smov 17   ;;  %vm104_vm4 = vcmask 261120   ;;  %vm106_vm5 = vcmask 277504   ;;  %vm108_vm6 = vcmask 392192   ;;  %vm110_vm7 = vcmask 408576  }
  0x15   :  { %s212_s24 = smov 19   ;;  %s213_s0 = smov 21   ;;  %vm112_vm8 = vcmask 523264   ;;  %vm114_vm9 = vcmask 539648   ;;  %vm116_vm10 = vcmask 654336   ;;  %vm48_vm11 = vcmask 138240  }
  0x16   :  { %s214_s25 = smov 23   ;;  %s215_s26 = smov 25   ;;  %vm50_vm12 = vcmask 252928   ;;  %vm52_vm13 = vcmask 269312   ;;  %vm54_vm14 = vcmask 384000   ;;  %vm56_vm15 = vcmask 400384  }
  0x17   :  { %82 = vrot.lane.b32.xlu0 %v21_v0, %s207_s19  ;;  %89 = vrot.lane.b32.xlu1 %v22_v1, %s208_s20  ;;  %s216_s27 = smov 27   ;;  %s217_s28 = smov 29  }
  0x18   :  { %s218_s29 = smov 31   ;;  %s219_s30 = smov 15  }
  0x19   :  { %s220_s2 = smov [#allocation5]  }
  0x1a   :  { %s132_s3 = sshll.u32 %s220_s2, 4  ;;  %s133_s3 = int_to_ptr.vmem [resolvable:$true] %s132_s3 }
  0x1b   :  { %92 = vrot.lane.b32.xlu0 %v22_v1, %s209_s21  ;;  %95 = vrot.lane.b32.xlu1 %v22_v1, %s210_s22  ;;  %s179_s4 = scalar_lea.vmem %s133_s3, 256  ;;  %p184_p9 = scmp.lt.s32.totalorder %s133_s3, %s133_s3 }
  0x1c   :  { %p180_p8 = scmp.ne.s32.totalorder %s133_s3, %s179_s4  ;;  %p185_p10 = scmp.lt.s32.totalorder %s179_s4, %s179_s4 }
  0x1e   :  { %p186_p11 = por %p185_p10, %p184_p9 }
  0x1f   :  { %24 = vrot.lane.b32.xlu0 %v21_v0, %s211_s23  ;;  %27 = vrot.lane.b32.xlu1 %v21_v0, %s212_s24 }
  0x20   :  { %p187_p12 = pnand %p186_p11, %p180_p8 }
  0x23   :  { %30 = vrot.lane.b32.xlu0 %v21_v0, %s213_s0  ;;  %33 = vrot.lane.b32.xlu1 %v21_v0, %s214_s25 }
  0x27   :  { %36 = vrot.lane.b32.xlu0 %v21_v0, %s215_s26  ;;  %39 = vrot.lane.b32.xlu1 %v21_v0, %s216_s27 }
  0x2b   :  { %42 = vrot.lane.b32.xlu0 %v21_v0, %s217_s28  ;;  %45 = vrot.lane.b32.xlu1 %v21_v0, %s218_s29 }
  0x85   :  { %v79_v2 = vpop.permute.xlu0 %78  ;;  %v85_v3 = vpop.permute.xlu1 %84 }
  0x86   :  { %v99_v4 = vsel %vm98_vm0, 0.0, %v79_v2  ;;  %vm58_vm0 = vcmask 515072  }
  0x87   :  { %v101_v7 = vsel %vm100_vm1, %v99_v4, 0.0  ;;  %vm60_vm1 = vcmask 531456  }
  0x89   :  { %v83_v5 = vpop.permute.xlu0 %82  ;;  %v90_v6 = vpop.permute.xlu1 %89 }
  0x8a   :  { %v87_v8 = vsel %vm86_vm2, %v83_v5, %v85_v3  ;;  %vm62_vm2 = vcmask 646144  }
  0x8b   :  { %v103_v9 = vsel %vm102_vm3, %v101_v7, %v87_v8  ;;  %vm64_vm3 = vcmask 662528  }
  0x8c   :  { %v105_v10 = vsel %vm104_vm4, %v103_v9, 0.0  ;;  %vm66_vm4 = vcmask 777216  }
  0x8d   :  { %v107_v11 = vsel %vm106_vm5, %v105_v10, %v90_v6  ;;  %v93_v12 = vpop.permute.xlu0 %92  ;;  %v96_v13 = vpop.permute.xlu1 %95  ;;  %vm68_vm5 = vcmask 793600  }
  0x8e   :  { %v109_v14 = vsel %vm108_vm6, %v107_v11, 0.0  ;;  %vm70_vm6 = vcmask 908288  }
  0x8f   :  { %v111_v15 = vsel %vm110_vm7, %v109_v14, %v93_v12  ;;  %vm72_vm7 = vcmask 924672  }
  0x90   :  { %v113_v16 = vsel %vm112_vm8, %v111_v15, 0.0  ;;  %vm74_vm8 = vcmask 1039360  }
  0x91   :  { %v115_v17 = vsel %vm114_vm9, %v113_v16, %v96_v13  ;;  %v25_v18 = vpop.permute.xlu0 %24  ;;  %v28_v19 = vpop.permute.xlu1 %27  ;;  %vm76_vm9 = vcmask 7168  }
  0x92   :  { %v117_v20 = vsel %vm116_vm10, %v115_v17, 0.0  ;;  %v49_v21 = vsel %vm48_vm11, 0.0, %v25_v18  ;;  %vm122_vm10 = vcmask 121856  }
  0x93   :  { %119 = vrot.lane.b32.xlu0 %v117_v20, %s219_s30  ;;  %v51_v22 = vsel %vm50_vm12, %v49_v21, 0.0 }
  0x94   :  { %v53_v23 = vsel %vm52_vm13, %v51_v22, %v28_v19 }
  0x95   :  { %v55_v24 = vsel %vm54_vm14, %v53_v23, 0.0  ;;  %v31_v25 = vpop.permute.xlu0 %30  ;;  %v34_v26 = vpop.permute.xlu1 %33 }
  0x96   :  { %v57_v27 = vsel %vm56_vm15, %v55_v24, %v31_v25 }
  0x97   :  { %v59_v28 = vsel %vm58_vm0, %v57_v27, 0.0 }
  0x98   :  { %v61_v29 = vsel %vm60_vm1, %v59_v28, %v34_v26 }
  0x99   :  { %v63_v30 = vsel %vm62_vm2, %v61_v29, 0.0  ;;  %v37_v31 = vpop.permute.xlu0 %36  ;;  %v40_v32 = vpop.permute.xlu1 %39 }
  0x9a   :  { %v65_v33 = vsel %vm64_vm3, %v63_v30, %v37_v31 }
  0x9b   :  { %v67_v34 = vsel %vm66_vm4, %v65_v33, 0.0 }
  0x9c   :  { %v69_v35 = vsel %vm68_vm5, %v67_v34, %v40_v32 }
  0x9d   :  { %v71_v36 = vsel %vm70_vm6, %v69_v35, 0.0  ;;  %v43_v37 = vpop.permute.xlu0 %42  ;;  %v46_v40 = vpop.permute.xlu1 %45 }
  0x9e   :  { %v73_v38 = vsel %vm72_vm7, %v71_v36, %v43_v37  ;;  %v77_v41 = vsel %vm76_vm9, 0.0, %v46_v40 }
  0x9f   :  { %v75_v39 = vsel %vm74_vm8, %v73_v38, 0.0 }
  0xa0   :  { %124 = vst [vmem:[#allocation5] sm:$0xff] %v75_v39 }
 0x105   :  { %v120_v42 = vpop.permute.xlu0 %119 }
 0x106   :  { %v123_v43 = vsel %vm122_vm10, %v77_v41, %v120_v42 }
 0x107   :  { %125 = vst [vmem:[#allocation5 + $0x8] sm:$0xff] %v123_v43 }
 0x108   :  { %190 = shalt.err (!%p187_p12)
}
 0x109   :  { %s191_s7 = scalar_lea.hbm %s256_s1, 256 }
 0x10a   :  { %p192_p13 = scmp.ne.s32.totalorder %s256_s1, %s191_s7  ;;  %p195_p0 = scmp.lt.u32.totalorder %s191_s7, %s256_s1 }
 0x10c   :  { %p197_p1 = pnand %p195_p0, %p192_p13 }
 0x10e   :  { %200 = shalt.err (!%p197_p1)
}
 0x10f   :  { %135 = dma.vmem_to_hbm [thread:$0]  %s133_s3, 256, %s256_s1, [#allocation4]  }
 0x110   :  { %203 = dma.done.wait [#allocation4], 256  }
 0x111   :  { %204 = vsyncadd [#allocation4], 4294967040 }
 0x112   :  { %139 = vsyncpa [#allocation3], 1 }
 0x113   :  { %140 = vsyncpa [#allocation4], 1 }

</bundles_post_ra>
